<compile_context>
chip_gen: v7x
topology: tpu7x:2x2x1
jax: 0.10.0
libtpu: 0.0.40
codegen_flags: <defaults>
</compile_context>

<pallas_src>
import functools

import jax
import jax.numpy as jnp
from jax.experimental import pallas as pl
from jax.experimental.pallas import tpu as pltpu


# ---------------------------------------------------------------------------
# ReLUX math, exactly the torch formula.  Shared by the Pallas kernel, the
# small-input bypass and the ragged tail so every path is bit-identical.
# ---------------------------------------------------------------------------
def _relux_math(x, scale: float):
    z = x * scale
    z = jnp.minimum(jnp.maximum(z, 0.0), 6.0)   # relu6 (propagates NaN like torch)
    return z / scale                            # true divide, bit-faithful


def _make_relux_kernel(scale: float):
    """Kernel with scale folded in as a compile-time constant (no SMEM operand)."""

    def kernel(x_ref, o_ref):
        o_ref[...] = _relux_math(x_ref[...], scale)

    return kernel


@functools.lru_cache(maxsize=None)
def _num_tensorcores() -> int:
    """Best-effort TensorCores-per-chip count (2 on v7x-class, else 1)."""
    try:
        info = pltpu.get_tpu_info()
    except Exception:
        return 1
    for attr in ("num_cores", "core_count", "num_tensorcores",
                 "tensorcores_per_chip", "cores_per_chip"):
        v = getattr(info, attr, None)
        if isinstance(v, int) and v > 0:
            return v
    return 1  # conservative: behave like a single-TC chip


def _choose_tile_rows(rows: int, lanes: int, dsize: int, num_cores: int,
                      target_bytes: int = 4 * 1024 * 1024) -> int:
    """Pick block rows targeting ~4 MiB blocks, dtype-packing aligned."""
    # Sublane packing granularity: 8 for f32, 16 for bf16, 32 for int8/fp8.
    sub = max(8, 32 // max(dsize, 1))
    tr = max(sub, (target_bytes // (lanes * dsize)) // sub * sub)
    if rows > tr:
        return tr
    # Whole rows dim fits in one block.
    if num_cores >= 2:
        # Give each TensorCore >= ~2 grid steps so cross-step DMA pipelining
        # overlaps on megacore chips (v7x).
        steps = 2 * num_cores
        cand = -(-rows // steps)            # ceil(rows / steps)
        cand = -(-cand // sub) * sub        # round up to packing granularity
        if sub <= cand < rows:
            return cand
    # Single-TC chips (v5e/v6e): one block, one grid step — no pointless split.
    return rows


def relux(x: jnp.ndarray, max_value: float = 1.0, *,
          min_pallas_bytes: int = 1 << 20) -> jnp.ndarray:
    """Elementwise ReLUX over an arbitrary-shaped array (e.g. NCHW)."""
    scale = 6.0 / float(max_value)
    orig_shape = x.shape
    n = x.size
    dsize = jnp.dtype(x.dtype).itemsize

    # Small-input bypass: dispatch + per-step Pallas overhead dominate tiny
    # tensors; plain jnp lets XLA fuse ReLUX and skip the extra HBM round-trip.
    if n * dsize < min_pallas_bytes:
        return _relux_math(x, scale)

    x_flat = x.reshape(-1)
    n_tail = n % 128
    n_main = n - n_tail
    if n_main == 0:
        return _relux_math(x, scale)

    # Widest lane-dense last dim (multiple of 128) dividing the main prefix.
    lanes = 128
    for cand in (2048, 1024, 512, 256):
        if n_main % cand == 0:
            lanes = cand
            break

    rows = n_main // lanes
    x_main = x_flat if n_tail == 0 else x_flat[:n_main]
    x2d = x_main.reshape(rows, lanes)

    num_cores = _num_tensorcores()
    tile_rows = _choose_tile_rows(rows, lanes, dsize, num_cores)
    grid = (pl.cdiv(rows, tile_rows),)

    block_bytes = tile_rows * lanes * dsize
    # Double-buffered in + out = 4 x block, plus headroom.  Well under the
    # 64 MiB (v7x) / 128 MiB (v5e/v6e) physical VMEM on every generation.
    vmem_limit = int(min(48 << 20, max(16 << 20, 4 * block_bytes + (8 << 20))))

    cost = pl.CostEstimate(
        flops=3 * n_main,                    # mul, clamp, div per element
        transcendentals=0,
        bytes_accessed=2 * n_main * dsize,   # read N + write N
    )

    out2d = pl.pallas_call(
        _make_relux_kernel(scale),
        out_shape=jax.ShapeDtypeStruct((rows, lanes), x.dtype),
        grid_spec=pltpu.PrefetchScalarGridSpec(
            num_scalar_prefetch=0,
            grid=grid,
            in_specs=[pl.BlockSpec((tile_rows, lanes), lambda i: (i, 0))],
            out_specs=pl.BlockSpec((tile_rows, lanes), lambda i: (i, 0)),
        ),
        compiler_params=pltpu.CompilerParams(
            dimension_semantics=("parallel",),
            vmem_limit_bytes=vmem_limit,
        ),
        cost_estimate=cost,
    )(x2d)

    if n_tail == 0:
        return out2d.reshape(orig_shape)

    # Ragged tail (< 128 elements): tiny jnp clip; no full-array pad / slice.
    tail_out = _relux_math(x_flat[n_main:], scale)
    return jnp.concatenate([out2d.reshape(-1), tail_out]).reshape(orig_shape)


def relux_ref(x, max_value: float = 1.0):
    return _relux_math(x, 6.0 / float(max_value))


if __name__ == "__main__":
    key = jax.random.PRNGKey(0)
    # NCHW input, small shapes consistent with the module (batch=2, ch=4, 16x16).
    x = jax.random.normal(key, (2, 4, 16, 16), dtype=jnp.float32) * 2.0
    max_value = 1.0
    y_ref = relux_ref(x, max_value=max_value)

    # Force the Pallas path on the small test so the kernel itself is exercised.
    y = jax.block_until_ready(relux(x, max_value=max_value, min_pallas_bytes=0))
    assert y.shape == x.shape and y.dtype == x.dtype
    assert jnp.allclose(y, y_ref, atol=1e-6), "mismatch vs reference (pallas path)"

    # Default call on the same tensor takes the fused-jnp small-input bypass.
    y_bypass = jax.block_until_ready(relux(x, max_value=max_value))
    assert jnp.allclose(y_bypass, y_ref, atol=1e-6), "mismatch vs reference (bypass)"

    # Larger case above the bypass threshold: multi-step Pallas path.
    x2 = jax.random.normal(jax.random.PRNGKey(1), (8, 16, 64, 64), dtype=jnp.float32)
    y2 = jax.block_until_ready(relux(x2, max_value=2.0))
    assert jnp.allclose(y2, relux_ref(x2, max_value=2.0), atol=1e-6)

    # Ragged flat size (not a multiple of 128): prefix-kernel + jnp-tail path.
    x3 = jax.random.normal(jax.random.PRNGKey(2), (300_000,), dtype=jnp.float32)
    y3 = jax.block_until_ready(relux(x3, max_value=1.5, min_pallas_bytes=0))
    assert jnp.allclose(y3, relux_ref(x3, max_value=1.5), atol=1e-6)

    print("KERNEL_OK")
</pallas_src>

<mosaic_0001>
module attributes {stable_mosaic.version = 11 : i64} {
  func.func @kernel(%arg0: i32, %arg1: memref<1x2048xf32, #tpu.memory_space<vmem>>, %arg2: memref<1x2048xf32, #tpu.memory_space<vmem>>) attributes {dimension_semantics = [#tpu.dimension_semantics<parallel>], iteration_bounds = array<i64: 1>, scalar_prefetch = 0 : i64, scratch_operands = 0 : i64, tpu.core_type = #tpu.core_type<tc>, window_params = [{transform_indices = @transform_0, window_bounds = array<i64: 1, 2048>}, {transform_indices = @transform_1, window_bounds = array<i64: 1, 2048>}]} {
    %c0 = arith.constant 0 : index
    %c0_0 = arith.constant 0 : index
    %0 = vector.load %arg1[%c0, %c0_0] : memref<1x2048xf32, #tpu.memory_space<vmem>>, vector<1x2048xf32>
    %cst = arith.constant 6.000000e+00 : f32
    %1 = vector.broadcast %cst : f32 to vector<1x2048xf32>
    %2 = arith.mulf %0, %1 : vector<1x2048xf32>
    %cst_1 = arith.constant 0.000000e+00 : f32
    %3 = vector.broadcast %cst_1 : f32 to vector<1x2048xf32>
    %4 = arith.maximumf %2, %3 : vector<1x2048xf32>
    %cst_2 = arith.constant 6.000000e+00 : f32
    %5 = vector.broadcast %cst_2 : f32 to vector<1x2048xf32>
    %6 = arith.minimumf %4, %5 : vector<1x2048xf32>
    %cst_3 = arith.constant 6.000000e+00 : f32
    %7 = vector.broadcast %cst_3 : f32 to vector<1x2048xf32>
    %8 = arith.divf %6, %7 : vector<1x2048xf32>
    %c0_4 = arith.constant 0 : index
    %c0_5 = arith.constant 0 : index
    %9 = vector.load %arg2[%c0_4, %c0_5] : memref<1x2048xf32, #tpu.memory_space<vmem>>, vector<1x2048xf32>
    tpu.vector_store %arg2[%c0_4, %c0_5], %8 {strides = array<i32>} : memref<1x2048xf32, #tpu.memory_space<vmem>>, vector<1x2048xf32>,
    return
  }
  func.func @transform_0(%arg0: i32) -> (i32, i32) {
    %c0_i32 = arith.constant 0 : i32
    %c0_i32_0 = arith.constant 0 : i32
    return %arg0, %c0_i32 : i32, i32
  }
  func.func @transform_1(%arg0: i32) -> (i32, i32) {
    %c0_i32 = arith.constant 0 : i32
    %c0_i32_0 = arith.constant 0 : i32
    return %arg0, %c0_i32 : i32, i32
  }
}

</mosaic_0001>

<bundles_post_ra>
// kernel: tpu_custom_call.1
= control target key start
LH: loop header
LB: loop body
LE: loop exit
PB: predicated region body
PF: predicated region fallthrough
CT: control target
= control target key end

     0   :  { %6 = vsyncpa [#allocation3], 0  ;;  %s135_s0 = inlined_call_operand.hbm [shape: f32[1,2048], index: 0, kind: input, shape index: {}]   ;;  %s136_s1 = inlined_call_operand.hbm [shape: f32[1,2048], index: 1, kind: output, shape index: {}]  }
   0x1   :  { %7 = vsyncpa [#allocation4], 0  ;;  %s99_s6 = smov [#allocation2]   ;;  %s51_s10 = scalar_lea.hbm %s135_s0, 256 }
   0x2   :  { %s14_s7 = sshll.u32 %s99_s6, 4  ;;  %p52_p0 = scmp.ne.s32.totalorder %s135_s0, %s51_s10  ;;  %s15_s7 = int_to_ptr.vmem [resolvable:$true] %s14_s7 }
   0x3   :  { %p55_p1 = scmp.lt.u32.totalorder %s51_s10, %s135_s0 }
   0x5   :  { %p57_p2 = pnand %p55_p1, %p52_p0 }
   0x7   :  { %60 = shalt.err (!%p57_p2)
}
   0x8   :  { %s61_s15 = scalar_lea.vmem %s15_s7, 256  ;;  %p66_p4 = scmp.lt.s32.totalorder %s15_s7, %s15_s7 }
   0x9   :  { %p62_p3 = scmp.ne.s32.totalorder %s15_s7, %s61_s15  ;;  %p67_p5 = scmp.lt.s32.totalorder %s61_s15, %s61_s15 }
   0xb   :  { %p68_p6 = por %p67_p5, %p66_p4 }
   0xd   :  { %p69_p7 = pnand %p68_p6, %p62_p3 }
   0xf   :  { %72 = shalt.err (!%p69_p7)
}
  0x10   :  { %17 = dma.hbm_to_vmem [thread:$0]  %s135_s0, 256, %s15_s7, [#allocation3]  }
  0x11   :  { %95 = dma.done.wait [#allocation3], 256  }
  0x12   :  { %96 = vsyncadd [#allocation3], 4294967040  ;;  %v21_v0 = vld [vmem:[#allocation2] sm:$0xff]  ;;  %v22_v1 = vld [vmem:[#allocation2 + $0x8] sm:$0xff]  ;;  %s100_s18 = smov [#allocation5]  }
  0x13   :  { %v23_v2 = vmul.f32 6.0, %v21_v0  ;;  %v24_v3 = vmul.f32 6.0, %v22_v1  ;;  %s40_s19 = sshll.u32 %s100_s18, 4  ;;  %s41_s19 = int_to_ptr.vmem [resolvable:$true] %s40_s19 }
  0x14   :  { %s73_s20 = scalar_lea.vmem %s41_s19, 256  ;;  %p78_p9 = scmp.lt.s32.totalorder %s41_s19, %s41_s19 }
  0x15   :  { %v25_v4 = vmax.f32 %v23_v2, 0.0  ;;  %v26_v5 = vmax.f32 %v24_v3, 0.0  ;;  %p74_p8 = scmp.ne.s32.totalorder %s41_s19, %s73_s20  ;;  %p79_p10 = scmp.lt.s32.totalorder %s73_s20, %s73_s20 }
  0x17   :  { %v27_v6 = vmin.f32 %v25_v4, 6.0  ;;  %v28_v7 = vmin.f32 %v26_v5, 6.0  ;;  %p80_p11 = por %p79_p10, %p78_p9 }
  0x19   :  { %v30_v8 = vmul.f32 0.16666667, %v27_v6  ;;  %v31_v9 = vmul.f32 0.16666667, %v28_v7  ;;  %p81_p12 = pnand %p80_p11, %p74_p8 }
  0x1b   :  { %32 = vst [vmem:[#allocation5] sm:$0xff] %v30_v8  ;;  %33 = vst [vmem:[#allocation5 + $0x8] sm:$0xff] %v31_v9 }
  0x1c   :  { %84 = shalt.err (!%p81_p12)
}
  0x1d   :  { %s85_s22 = scalar_lea.hbm %s136_s1, 256 }
  0x1e   :  { %p86_p13 = scmp.ne.s32.totalorder %s136_s1, %s85_s22  ;;  %p89_p0 = scmp.lt.u32.totalorder %s85_s22, %s136_s1 }
  0x20   :  { %p91_p1 = pnand %p89_p0, %p86_p13 }
  0x22   :  { %94 = shalt.err (!%p91_p1)
}
  0x23   :  { %43 = dma.vmem_to_hbm [thread:$0]  %s41_s19, 256, %s136_s1, [#allocation4]  }
  0x24   :  { %97 = dma.done.wait [#allocation4], 256  }
  0x25   :  { %98 = vsyncadd [#allocation4], 4294967040 }
  0x26   :  { %47 = vsyncpa [#allocation3], 1 }
  0x27   :  { %48 = vsyncpa [#allocation4], 1 }

</bundles_post_ra>
